<compile_context>
chip_gen: v5e
topology: v5e:2x2
jax: 0.10.0
libtpu: 0.0.40
codegen_flags: <defaults>
</compile_context>

<pallas_src>
import jax
import jax.numpy as jnp
from jax.experimental import pallas as pl
from jax.experimental.pallas import tpu as pltpu


def _round_up(x, m):
    return ((x + m - 1) // m) * m


# ---------------------------------------------------------------------------
# Fused FFN kernel body. One (tm, D) row-tile of the flattened activation slab
# per grid step; weights/biases are resident (constant index_map).
#   x_ref  : (tm, D)  activations (input dtype, f32 or bf16)
#   w1_ref : (D, D)   layer1 weight, pre-transposed to (in, out)
#   b1_ref : (1, D)   f32
#   w2_ref : (D, D)   layer2 weight, pre-transposed to (in, out)
#   b2_ref : (1, D)   f32
#   o_ref  : (tm, D)  same dtype as the activations
# ---------------------------------------------------------------------------
def _ffn_kernel(x_ref, w1_ref, b1_ref, w2_ref, b2_ref, o_ref):
    h = jnp.dot(x_ref[...], w1_ref[...],
                preferred_element_type=jnp.float32) + b1_ref[...]
    # TODO(synk): PyTorch F.gelu defaults to the exact erf GELU; the tanh
    # approximation is used here for Mosaic portability (small numeric drift).
    h = jax.nn.gelu(h, approximate=True)
    h = h.astype(w2_ref.dtype)  # no-op in the f32 path; bf16 MXU operand otherwise
    o_ref[...] = (jnp.dot(h, w2_ref[...], preferred_element_type=jnp.float32)
                  + b2_ref[...]).astype(o_ref.dtype)


# ---------------------------------------------------------------------------
# One-time parameter prep (call OUTSIDE jit): transpose PyTorch (out, in)
# weights to (in, out), reshape biases to (1, D), optionally cast weights to
# bf16 for the MXU-operand / halved-weight-DMA path. Biases stay f32.
# ---------------------------------------------------------------------------
def prepare_ffn_params(w1, b1, w2, b2, param_dtype=jnp.float32):
    return (w1.T.astype(param_dtype), b1.reshape(1, -1).astype(jnp.float32),
            w2.T.astype(param_dtype), b2.reshape(1, -1).astype(jnp.float32))


def _choose_row_tile(n8, block_m):
    """Pick a row tile (multiple of 8). Prefers an exact divisor of n8 (no pad
    copy) and >=2 grid steps so v7x megacore sharding is effective."""
    max_tm = max(8, (min(block_m, n8) // 8) * 8)
    if n8 >= 16:  # ensure the "parallel" grid axis has at least 2 steps
        max_tm = min(max_tm, _round_up((n8 + 1) // 2, 8))
    best = 8
    for cand in range(max_tm, 7, -8):
        if n8 % cand == 0:
            best = cand
            break
    # Accept a pad copy only when every exact divisor would make tiles tiny.
    if best >= max(max_tm // 4, 8) or best >= 512:
        tm = best
    else:
        tm = max_tm
    return tm, _round_up(n8, tm)


# ---------------------------------------------------------------------------
# Wrapper: flatten leading dims, row-tile, call the fused kernel.
# Expects weights already transposed to (in, out) and biases shaped (1, D)
# (use prepare_ffn_params once, outside the jitted call path).
# ---------------------------------------------------------------------------
def feed_forward_block(x, w1t, b1, w2t, b2, *, block_m=4096, act_buffers=None):
    orig_shape = x.shape
    d = w1t.shape[0]
    assert orig_shape[-1] == d and w1t.shape == (d, d) and w2t.shape == (d, d)

    x2 = x.reshape(-1, d)          # keep input dtype: no f32 upcast copy in HBM
    n = x2.shape[0]
    b1 = b1.reshape(1, d).astype(jnp.float32)
    b2 = b2.reshape(1, d).astype(jnp.float32)
    out_dtype = x.dtype

    n8 = _round_up(n, 8)
    tm, n_pad = _choose_row_tile(n8, block_m)
    if n_pad != n:
        # Last resort (sublane / tile remainder); tile choice avoids this when
        # an exact divisor exists, so the extra slab copy is rarely paid.
        x2 = jnp.pad(x2, ((0, n_pad - n), (0, 0)))

    grid = (n_pad // tm,)

    # Resident operands (constant index_map): single-buffer to halve weight VMEM.
    resident = dict(pipeline_mode=pl.Buffered(1))
    if act_buffers is None:
        act_spec = pl.BlockSpec((tm, d), lambda i: (i, 0))
    else:  # e.g. act_buffers=3 on v5e if DMA is still exposed after tiling up
        act_spec = pl.BlockSpec((tm, d), lambda i: (i, 0),
                                pipeline_mode=pl.Buffered(act_buffers))

    # Explicit VMEM budget (lane-padded tiles), capped below v7x's 64 MiB phys.
    lane_d = _round_up(d, 128)
    sub_d = _round_up(d, 8)
    act_b = jnp.dtype(x2.dtype).itemsize
    out_b = jnp.dtype(out_dtype).itemsize
    w_b = jnp.dtype(w1t.dtype).itemsize
    needed = ((act_buffers or 2) * tm * lane_d * act_b      # activation in
              + 2 * tm * lane_d * out_b                     # output
              + 2 * sub_d * lane_d * w_b                    # w1 + w2 (1 buffer each)
              + 2 * 8 * lane_d * 4)                         # biases
    vmem_limit = int(min(64 * 1024 * 1024, max(8 * 1024 * 1024, 3 * needed)))

    cost = pl.CostEstimate(
        flops=4 * n_pad * d * d,                 # two (tm,D)x(D,D) matmuls
        transcendentals=n_pad * d,               # tanh per GELU element
        bytes_accessed=n_pad * d * (act_b + out_b) + 2 * d * d * w_b + 2 * d * 4,
    )

    out = pl.pallas_call(
        _ffn_kernel,
        out_shape=jax.ShapeDtypeStruct((n_pad, d), out_dtype),
        grid_spec=pltpu.PrefetchScalarGridSpec(
            num_scalar_prefetch=0,
            grid=grid,
            in_specs=[
                act_spec,                                          # activations (tiled rows)
                pl.BlockSpec((d, d), lambda i: (0, 0), **resident),  # w1^T resident
                pl.BlockSpec((1, d), lambda i: (0, 0), **resident),  # b1
                pl.BlockSpec((d, d), lambda i: (0, 0), **resident),  # w2^T resident
                pl.BlockSpec((1, d), lambda i: (0, 0), **resident),  # b2
            ],
            out_specs=pl.BlockSpec((tm, d), lambda i: (i, 0)),
        ),
        compiler_params=pltpu.CompilerParams(
            dimension_semantics=("parallel",),
            vmem_limit_bytes=vmem_limit,
        ),
        cost_estimate=cost,
    )(x2, w1t, b1, w2t, b2)
    # TODO(synk): if dim_ff ever grows past VMEM-resident weights (v7x 64 MiB),
    # add a K grid axis marked "arbitrary" with a f32 VMEM accumulator instead
    # of whole-weight residency.

    if n_pad != n:
        out = out[:n]
    return out.reshape(orig_shape)


# ---------------------------------------------------------------------------
if __name__ == "__main__":
    DIM_FF = 32          # dim_ff
    B, S = 2, 8          # leading (batch, seq) dims of ffn_in

    key = jax.random.PRNGKey(0)
    k1, k2, k3, k4, k5 = jax.random.split(key, 5)
    # nn.Linear parameters (PyTorch layout: weight is (out_features, in_features))
    w1 = 0.05 * jax.random.normal(k1, (DIM_FF, DIM_FF), jnp.float32)
    b1 = 0.05 * jax.random.normal(k2, (DIM_FF,), jnp.float32)
    w2 = 0.05 * jax.random.normal(k3, (DIM_FF, DIM_FF), jnp.float32)
    b2 = 0.05 * jax.random.normal(k4, (DIM_FF,), jnp.float32)
    x = jax.random.normal(k5, (B, S, DIM_FF), jnp.float32)

    # Transpose / reshape (and optionally bf16-cast) ONCE, outside the jitted call.
    w1t, b1r, w2t, b2r = prepare_ffn_params(w1, b1, w2, b2, param_dtype=jnp.float32)

    fwd = jax.jit(feed_forward_block)
    out = fwd(x, w1t, b1r, w2t, b2r)
    jax.block_until_ready(out)

    # Pure-JAX reference with the same (tanh-approx) GELU as the kernel.
    ref = jnp.dot(jax.nn.gelu(jnp.dot(x, w1.T) + b1, approximate=True), w2.T) + b2

    assert out.shape == (B, S, DIM_FF) and out.dtype == jnp.float32
    assert bool(jnp.all(jnp.isfinite(out)))
    assert bool(jnp.allclose(out, ref, atol=1e-5, rtol=1e-5))
    print("KERNEL_OK")
</pallas_src>

<mosaic_0001>
module attributes {stable_mosaic.version = 11 : i64} {
  func.func @_ffn_kernel(%arg0: i32, %arg1: memref<8x32xf32, #tpu.memory_space<vmem>>, %arg2: memref<32x32xf32, #tpu.memory_space<vmem>>, %arg3: memref<1x32xf32, #tpu.memory_space<vmem>>, %arg4: memref<32x32xf32, #tpu.memory_space<vmem>>, %arg5: memref<1x32xf32, #tpu.memory_space<vmem>>, %arg6: memref<8x32xf32, #tpu.memory_space<vmem>>) attributes {dimension_semantics = [#tpu.dimension_semantics<parallel>], iteration_bounds = array<i64: 2>, scalar_prefetch = 0 : i64, scratch_operands = 0 : i64, tpu.core_type = #tpu.core_type<tc>, window_params = [{transform_indices = @transform_0, window_bounds = array<i64: 8, 32>}, {pipeline_mode = #tpu.pipeline_mode<synchronous>, transform_indices = @transform_1, window_bounds = array<i64: 32, 32>}, {pipeline_mode = #tpu.pipeline_mode<synchronous>, transform_indices = @transform_2, window_bounds = array<i64: 1, 32>}, {pipeline_mode = #tpu.pipeline_mode<synchronous>, transform_indices = @transform_3, window_bounds = array<i64: 32, 32>}, {pipeline_mode = #tpu.pipeline_mode<synchronous>, transform_indices = @transform_4, window_bounds = array<i64: 1, 32>}, {transform_indices = @transform_5, window_bounds = array<i64: 8, 32>}]} {
    %c0 = arith.constant 0 : index
    %c0_0 = arith.constant 0 : index
    %0 = vector.load %arg1[%c0, %c0_0] : memref<8x32xf32, #tpu.memory_space<vmem>>, vector<8x32xf32>
    %c0_1 = arith.constant 0 : index
    %c0_2 = arith.constant 0 : index
    %1 = vector.load %arg2[%c0_1, %c0_2] : memref<32x32xf32, #tpu.memory_space<vmem>>, vector<32x32xf32>
    %cst = arith.constant dense<0.000000e+00> : vector<8x32xf32>
    %2 = tpu.matmul %0, %1, %cst {dimension_numbers = #tpu.dot_dimension_numbers<[1], [0], [0], [1], [0, 0, 1, 1], [], []>} : vector<8x32xf32>, vector<32x32xf32>, vector<8x32xf32> -> vector<8x32xf32>
    %c0_3 = arith.constant 0 : index
    %c0_4 = arith.constant 0 : index
    %3 = vector.load %arg3[%c0_3, %c0_4] : memref<1x32xf32, #tpu.memory_space<vmem>>, vector<1x32xf32>
    %4 = vector.broadcast %3 : vector<1x32xf32> to vector<8x32xf32>
    %5 = arith.addf %2, %4 : vector<8x32xf32>
    %6 = arith.mulf %5, %5 : vector<8x32xf32>
    %7 = arith.mulf %5, %6 : vector<8x32xf32>
    %cst_5 = arith.constant 4.471500e-02 : f32
    %8 = vector.broadcast %cst_5 : f32 to vector<8x32xf32>
    %9 = arith.mulf %8, %7 : vector<8x32xf32>
    %10 = arith.addf %5, %9 : vector<8x32xf32>
    %cst_6 = arith.constant 0.797884583 : f32
    %11 = vector.broadcast %cst_6 : f32 to vector<8x32xf32>
    %12 = arith.mulf %11, %10 : vector<8x32xf32>
    %13 = math.tanh %12 : vector<8x32xf32>
    %cst_7 = arith.constant 1.000000e+00 : f32
    %14 = vector.broadcast %cst_7 : f32 to vector<8x32xf32>
    %15 = arith.addf %14, %13 : vector<8x32xf32>
    %cst_8 = arith.constant 5.000000e-01 : f32
    %16 = vector.broadcast %cst_8 : f32 to vector<8x32xf32>
    %17 = arith.mulf %16, %15 : vector<8x32xf32>
    %18 = arith.mulf %5, %17 : vector<8x32xf32>
    %c0_9 = arith.constant 0 : index
    %c0_10 = arith.constant 0 : index
    %19 = vector.load %arg4[%c0_9, %c0_10] : memref<32x32xf32, #tpu.memory_space<vmem>>, vector<32x32xf32>
    %cst_11 = arith.constant dense<0.000000e+00> : vector<8x32xf32>
    %20 = tpu.matmul %18, %19, %cst_11 {dimension_numbers = #tpu.dot_dimension_numbers<[1], [0], [0], [1], [0, 0, 1, 1], [], []>} : vector<8x32xf32>, vector<32x32xf32>, vector<8x32xf32> -> vector<8x32xf32>
    %c0_12 = arith.constant 0 : index
    %c0_13 = arith.constant 0 : index
    %21 = vector.load %arg5[%c0_12, %c0_13] : memref<1x32xf32, #tpu.memory_space<vmem>>, vector<1x32xf32>
    %22 = vector.broadcast %21 : vector<1x32xf32> to vector<8x32xf32>
    %23 = arith.addf %20, %22 : vector<8x32xf32>
    %c0_14 = arith.constant 0 : index
    %c0_15 = arith.constant 0 : index
    %24 = vector.load %arg6[%c0_14, %c0_15] : memref<8x32xf32, #tpu.memory_space<vmem>>, vector<8x32xf32>
    tpu.vector_store %arg6[%c0_14, %c0_15], %23 {strides = array<i32>} : memref<8x32xf32, #tpu.memory_space<vmem>>, vector<8x32xf32>,
    return
  }
  func.func @transform_0(%arg0: i32) -> (i32, i32) {
    %c0_i32 = arith.constant 0 : i32
    %c0_i32_0 = arith.constant 0 : i32
    return %arg0, %c0_i32 : i32, i32
  }
  func.func @transform_1(%arg0: i32) -> (i32, i32) {
    %c0_i32 = arith.constant 0 : i32
    %c0_i32_0 = arith.constant 0 : i32
    %c0_i32_1 = arith.constant 0 : i32
    return %c0_i32, %c0_i32_0 : i32, i32
  }
  func.func @transform_2(%arg0: i32) -> (i32, i32) {
    %c0_i32 = arith.constant 0 : i32
    %c0_i32_0 = arith.constant 0 : i32
    %c0_i32_1 = arith.constant 0 : i32
    return %c0_i32, %c0_i32_0 : i32, i32
  }
  func.func @transform_3(%arg0: i32) -> (i32, i32) {
    %c0_i32 = arith.constant 0 : i32
    %c0_i32_0 = arith.constant 0 : i32
    %c0_i32_1 = arith.constant 0 : i32
    return %c0_i32, %c0_i32_0 : i32, i32
  }
  func.func @transform_4(%arg0: i32) -> (i32, i32) {
    %c0_i32 = arith.constant 0 : i32
    %c0_i32_0 = arith.constant 0 : i32
    %c0_i32_1 = arith.constant 0 : i32
    return %c0_i32, %c0_i32_0 : i32, i32
  }
  func.func @transform_5(%arg0: i32) -> (i32, i32) {
    %c0_i32 = arith.constant 0 : i32
    %c0_i32_0 = arith.constant 0 : i32
    return %arg0, %c0_i32 : i32, i32
  }
}

</mosaic_0001>

<bundles_post_ra>
// kernel: feed_forward_block.1
= control target key start
LH: loop header
LB: loop body
LE: loop exit
PB: predicated region body
PF: predicated region fallthrough
CT: control target
= control target key end

     0   :  { %10 = vsyncpa [#allocation3], 0  ;;  %s899_s0 = inlined_call_operand.hbm [shape: f32[16,32], index: 0, kind: input, shape index: {}]   ;;  %s900_s1 = inlined_call_operand.hbm [shape: f32[32,32], index: 1, kind: input, shape index: {}]   ;;  %s901_s2 = inlined_call_operand.vmem [shape: f32[1,32], index: 2, kind: input, shape index: {}]   ;;  %s902_s3 = inlined_call_operand.hbm [shape: f32[32,32], index: 3, kind: input, shape index: {}]   ;;  %s903_s4 = inlined_call_operand.vmem [shape: f32[1,32], index: 4, kind: input, shape index: {}]   ;;  %s904_s5 = inlined_call_operand.hbm [shape: f32[16,32], index: 5, kind: output, shape index: {}]  }
   0x1   :  { %12 = vsyncpa [#allocation3 + $0x1], 0 }
   0x2   :  { %13 = vsyncpa [#allocation6], 0 }
   0x3   :  { %14 = vsyncpa [#allocation4], 0 }
   0x4   :  { %16 = vsyncpa [#allocation4 + $0x1], 0  ;;  %s741_s18 = smov 0   ;;  %s743_s19 = smov 0  }
   0x5   :  { %s745_s20 = smov 0   ;;  %s747_s21 = smov 0  }
   0x6 LB: > { %s174_s24 = sshll.u32 %s900_s1, 4  ;;  %s765_s25 = sadd.s32 4294967295, %s705_s21   ;;  %s705_s21 = sphi %s747_s21, %s915_s21   ;;  %s701_s20 = sphi %s745_s20, %s914_s20   ;;  %s697_s19 = sphi %s743_s19, %s913_s19   ;;  %s693_s18 = sphi %s741_s18, %s912_s18   ;;  %s175_s24 = int_to_ptr.hbm [resolvable:$true] %s174_s24 }
   0x7   : > { %p455_p0 = scmp.ge.s32.totalorder %s705_s21, 1  ;;  %p43_p1 = scmp.eq.s32.totalorder %s765_s25, 0 }
   0x8   : > { %p163_p2 = scmp.lt.s32.totalorder %s705_s21, 3  ;;  %s707_s27 = smov [#allocation5]  }
   0x9   : > { %s176_s28 = sshll.u32 %s707_s27, 4  ;;  %s191_s6 = sshll.u32 %s902_s3, 4  ;;  %s177_s28 = int_to_ptr.vmem [resolvable:$true] %s176_s28  ;;  %s192_s6 = int_to_ptr.hbm [resolvable:$true] %s191_s6 }
   0xa   : > { %p770_p3 = pnand %p455_p0, %p163_p2  ;;  %s708_s7 = smov [#allocation7]  }
   0xb   : > { %s193_s8 = sshll.u32 %s708_s7, 4  ;;  %s709_s9 = smov 128   ;;  %s194_s8 = int_to_ptr.vmem [resolvable:$true] %s193_s8 }
   0xc   : > { %p484_p4 = pneg %p770_p3  ;;  %s710_s10 = smov 8  }
   0xd   : > { %s454_s11 = sadd.s32 4294967294, %s705_s21   ;;  %s784_s12 = sadd.s32 1, %s705_s21  }
   0xe   : > { %p485_p6 = pnand %p484_p4, %p43_p1  ;;  %s26_s13 = ssub.s32 %s705_s21, %s784_s12 }
   0xf   : > { %s29_s14 = sadd.s32 1, %s701_s20  ;;  %p27_p7 = scmp.eq.s32.totalorder %s26_s13, 0 }
  0x10   : > { %487 = dma.hbm_to_vmem [thread:$0]  (!%p485_p6), %s175_s24, 512, %s177_s28, [#allocation6], %s709_s9, %s709_s9, %s710_s10  }
  0x11   : > { %490 = dma.hbm_to_vmem [thread:$0]  (!%p485_p6), %s192_s6, 512, %s194_s8, [#allocation6], %s709_s9, %s709_s9, %s710_s10  }
  0x12   : > { %p36_p8 = scmp.ne.s32.totalorder %s701_s20, %s697_s19  ;;  %p37_p9 = scmp.eq.s32.totalorder %s705_s21, 0 }
  0x13   : > { %p42_p10 = scmp.ne.s32.totalorder %s697_s19, %s693_s18  ;;  %p150_p13 = scmp.eq.s32.totalorder %s765_s25, 1 }
  0x14   : > { %s795_s15 = scalar_select %p27_p7, %s701_s20, %s29_s14  }
  0x15   : > { %p797_p11 = por %p37_p9, %p36_p8  ;;  %p803_p12 = por %p43_p1, %p42_p10 }
  0x16   : > { %p156_p0 = scmp.eq.s32.totalorder %s454_s11, 1  ;;  %p501_p2 = scmp.lt.s32.totalorder %s705_s21, 2 }
  0x17   : > { %s210_s22 = sand.u32 1, %s701_s20   ;;  %p810_p4 = por %p150_p13, %p36_p8 }
  0x18   : > { %p814_p6 = por %p156_p0, %p42_p10  ;;  %s459_s27 = sshll.u32 %s210_s22, 3 }
  0x19   : > { %s460_s28 = sshll.u32 %s705_s21, 3  ;;  %s214_s7 = scalar_lea.vmem [#allocation2], %s459_s27 }
  0x1a   : > { %s218_s6 = scalar_lea.hbm %s899_s0, %s460_s28  ;;  %s222_s8 = sshll.u32 %s214_s7, 4  ;;  %s223_s8 = int_to_ptr.vmem [resolvable:$true] %s222_s8 }
  0x1b   : > { %s220_s9 = sshll.u32 %s218_s6, 4  ;;  %p824_p7 = pnand %p501_p2, %p797_p11  ;;  %s221_s9 = int_to_ptr.hbm [resolvable:$true] %s220_s9 }
  0x1c   : > { %s211_s11 = scalar_lea.sflag [#allocation3], %s210_s22  ;;  %s605_s13 = sshra.s32 %s221_s9, 4  ;;  %s606_s13 = int_to_ptr.hbm [resolvable:$true] %s605_s13 }
  0x1d   : > { %s607_s14 = scalar_lea.hbm %s606_s13, 8  ;;  %p609_p9 = pneg %p824_p7 }
  0x1e   : > { %p608_p8 = scmp.ne.s32.totalorder %s606_s13, %s607_s14  ;;  %s612_s29 = scalar_lea.hbm %s899_s0, 16 }
  0x1f   : > { %p613_p11 = scmp.lt.s32.totalorder %s606_s13, %s899_s0  ;;  %p614_p0 = scmp.lt.s32.totalorder %s612_s29, %s607_s14 }
  0x20   : > { %p610_p10 = pnand %p609_p9, %p608_p8 }
  0x21   : > { %p615_p2 = por %p614_p0, %p613_p11 }
  0x22   : > { %p611_p13 = pneg %p610_p10 }
  0x24   : > { %p616_p5 = pnand %p615_p2, %p611_p13 }
  0x26   : > { %619 = shalt.err (!%p616_p5)
}
  0x27   : > { %494 = dma.hbm_to_vmem [thread:$0]  (!%p824_p7), %s221_s9, 128, %s223_s8, %s211_s11  }
  0x28   : > { %231 = sbr.rel (%p770_p3) target bundleno = 338 (0x152), region = 40  ;;  %s841_s22 = sand.u32 (!%p770_p3), 1, %s697_s19  }
  0x29   : > { %s462_s6 = sshll.u32 (!%p770_p3), %s841_s22, 3  ;;  %s234_s7 = scalar_lea.sflag (!%p770_p3), [#allocation3], %s841_s22 }
  0x2a   : > { %s237_s13 = scalar_lea.vmem (!%p770_p3), [#allocation2], %s462_s6 }
  0x2d   : > { %680 = dma.done.wait (%p803_p12), %s234_s7, 128  }
  0x2e   : > { %682 = vsyncadd (%p803_p12), %s234_s7, 4294967168 }
  0x2f   : > { %684 = dma.done.wait (%p43_p1), [#allocation6], 1024  }
  0x30   : > { %686 = vsyncadd (%p43_p1), [#allocation6], 4294966272  ;;  %v279_v0 = vld [vmem:[#allocation5 + $0x18] sm:$0xff]  ;;  %v278_v1 = vld [vmem:[#allocation5 + $0x10] sm:$0xff]  ;;  %vm284_vm0 = vcmask 261120   ;;  %s469_s8 = sshll.u32 %s765_s25, 3 }
  0x31   : > { %300 = vmatpush.msra.mxu0 %v279_v0  ;;  %v277_v2 = vld [vmem:[#allocation5 + $0x8] sm:$0xff]  ;;  %v276_v3 = vld [vmem:[#allocation5] sm:$0xff]  ;;  %v275_v4 = vld [vmem:[%s237_s13] sm:$0xff]  ;;  %s360_s11 = scalar_lea.hbm %s904_s5, %s469_s8  ;;  %s274_s28 = scalar_lea.vmem [#allocation8], %s462_s6 }
  0x32   : > { %v320_v5 = vld [vmem:[#allocation7 + $0x18] sm:$0xff]  ;;  %v319_v6 = vld [vmem:[#allocation7 + $0x10] sm:$0xff]  ;;  %v318_v7 = vld [vmem:[#allocation7 + $0x8] sm:$0xff]  ;;  %s362_s29 = sshll.u32 %s274_s28, 4  ;;  %s364_s30 = sshll.u32 %s360_s11, 4  ;;  %s363_s29 = int_to_ptr.vmem [resolvable:$true] %s362_s29  ;;  %s365_s30 = int_to_ptr.hbm [resolvable:$true] %s364_s30 }
  0x33   : > { %301 = vmatpush.msra.mxu0 %v278_v1  ;;  %340 = vmatpush.msra.mxu1 %v320_v5  ;;  %v317_v8 = vld [vmem:[#allocation7] sm:$0xff]  ;;  %v541_v9 = vld [vmem:[%s901_s2] ss:$0 sm:$0xff]  ;;  %s350_s25 = scalar_lea.sflag [#allocation4], %s841_s22  ;;  %s649_s16 = sshra.s32 %s365_s30, 4  ;;  %s650_s16 = int_to_ptr.hbm [resolvable:$true] %s649_s16 }
  0x34   : > { %v542_v21 = vld [vmem:[%s903_s4] ss:$0 sm:$0xff]  ;;  %s651_s7 = scalar_lea.hbm %s650_s16, 8  ;;  %s655_s6 = scalar_lea.hbm %s904_s5, 16 }
  0x35   : > { %302 = vmatpush.msra.mxu0 %v277_v2  ;;  %341 = vmatpush.msra.mxu1 %v319_v6  ;;  %p652_p1 = scmp.ne.s32.totalorder %s650_s16, %s651_s7  ;;  %p656_p12 = scmp.lt.s32.totalorder %s650_s16, %s904_s5 }
  0x36   : > { %p657_p7 = scmp.lt.s32.totalorder %s655_s6, %s651_s7 }
  0x37   : > { %303 = vmatpush.msra.mxu0 %v276_v3  ;;  %342 = vmatpush.msra.mxu1 %v318_v7  ;;  %p653_p3 = pnand %p652_p1, %p810_p4 }
  0x38   : > { %466 = vmatmul.msk.f32.vlgmr.msra.gmra.mxu0 %vm284_vm0, %v275_v4  ;;  %p658_p8 = por %p657_p7, %p656_p12 }
  0x39   : > { %343 = vmatpush.msra.mxu1 %v317_v8  ;;  %p654_p5 = pneg %p653_p3 }
  0x3b   : > { %p659_p9 = pnand %p658_p8, %p654_p5 }
  0xb5   : > { %v305_v10 = vpop.f32.mrf.mxu0 }
  0xb6   : > { %v306_v11 = vadd.f32 %v541_v9, %v305_v10 }
  0xb8   : > { %v308_v12 = vmul.f32 %v306_v11, %v306_v11 }
  0xba   : > { %v309_v13 = vmul.f32 %v308_v12, %v306_v11 }
  0xbc   : > { %v310_v14 = vmul.f32 0.044715, %v309_v13 }
  0xbe   : > { %v311_v15 = vadd.f32 %v310_v14, %v306_v11 }
  0xc0   : > { %v312_v16 = vmul.f32 0.7978846, %v311_v15 }
  0xc2   : > { %543 = vtanh.f32 %v312_v16 }
  0xc8   : > { %v544_v17 = vpop.eup %543 }
  0xc9   : > { %v314_v18 = vadd.f32 1.0, %v544_v17 }
  0xcb   : > { %v315_v19 = vmul.f32 0.5, %v314_v18 }
  0xcd   : > { %v316_v20 = vmul.f32 %v315_v19, %v306_v11 }
  0xcf   : > { %467 = vmatmul.msk.f32.vlgmr.msra.gmra.mxu1 %vm284_vm0, %v316_v20 }
 0x14c   : > { %v345_v22 = vpop.f32.mrf.mxu1 }
 0x14d   : > { %v346_v23 = vadd.f32 %v542_v21, %v345_v22 }
 0x14f   : > { %348 = vst.msk [vmem:[%s274_s28] sm:$0xff] %vm284_vm0, %v346_v23 }
 0x150   : > { %662 = shalt.err (!%p659_p9)
}
 0x151   : > { %482 = dma.vmem_to_hbm [thread:$0]  (%p810_p4), %s363_s29, 128, %s365_s30, %s350_s25  }
 0x152 PF: > { %s376_s22 = sand.u32 1, %s693_s18   ;;  %p911_p10 = scmp.ge.s32.totalorder %s705_s21, 2 }
 0x153   : > { %s377_s9 = scalar_lea.sflag [#allocation4], %s376_s22 }
 0x154   : > { %p496_p13 = pnand %p911_p10, %p814_p6 }
 0x156   : > { %p497_p11 = pneg %p496_p13 }
 0x158   : > { %688 = dma.done.wait (%p497_p11), %s377_s9, 128  }
 0x159   : > { %690 = vsyncadd (%p497_p11), %s377_s9, 4294967168  ;;  %p19_p0 = scmp.ge.s32.totalorder %s784_s12, 4   ;;  %s912_s18 = smov %s697_s19 }
 0x15a   : > { %s913_s19 = smov %s701_s20  ;;  %s914_s20 = smov %s795_s15 }
 0x15b   : > { %s915_s21 = smov %s784_s12  ;;  %21 = sbr.rel (!%p19_p0) target bundleno = 6 (0x6), region = 93 }
 0x160   :  { %383 = vsyncpa [#allocation3], 1 }
 0x161   :  { %385 = vsyncpa [#allocation3 + $0x1], 1 }
 0x162   :  { %386 = vsyncpa [#allocation6], 1 }
 0x163   :  { %387 = vsyncpa [#allocation4], 1 }
 0x164   :  { %389 = vsyncpa [#allocation4 + $0x1], 1 }

</bundles_post_ra>
